<compile_context>
chip_gen: v6e
topology: v6e:2x2x1
jax: 0.10.0
libtpu: 0.0.40
codegen_flags: <defaults>
</compile_context>

<pallas_src>
import functools

import jax
import jax.numpy as jnp
from jax import lax
from jax.experimental import pallas as pl
from jax.experimental.pallas import tpu as pltpu


# ----------------------------------------------------------------------------
# Kernels.
# ----------------------------------------------------------------------------
def _sum2d_kernel(x_ref, sum_ref, *, n_total, mask_rows):
    # x_ref: (nb, cb) block of (N, C); sum_ref: (1, cb) fp32 resident accumulator.
    ni = pl.program_id(1)

    @pl.when(ni == 0)
    def _():
        sum_ref[...] = jnp.zeros_like(sum_ref)

    x = x_ref[...].astype(jnp.float32)
    if mask_rows:
        nb, cb = x_ref.shape
        rid = lax.broadcasted_iota(jnp.int32, (nb, cb), 0) + ni * nb
        x = jnp.where(rid < n_total, x, 0.0)
    sum_ref[...] += jnp.sum(x, axis=0, keepdims=True)


def _sum3d_kernel(x_ref, sum_ref, *, n_total, l_total, mask_rows, mask_lanes):
    # x_ref: (nb, cb, lb) block of (N, C, L); sum_ref: (cb, 1) fp32 accumulator.
    ni = pl.program_id(1)
    li = pl.program_id(2)

    @pl.when((ni == 0) & (li == 0))
    def _():
        sum_ref[...] = jnp.zeros_like(sum_ref)

    x = x_ref[...].astype(jnp.float32)
    nb, cb, lb = x_ref.shape
    if mask_rows or mask_lanes:
        mask = None
        if mask_rows:
            rid = lax.broadcasted_iota(jnp.int32, (nb, cb, lb), 0) + ni * nb
            mask = rid < n_total
        if mask_lanes:
            lid = lax.broadcasted_iota(jnp.int32, (nb, cb, lb), 2) + li * lb
            lmask = lid < l_total
            mask = lmask if mask is None else (mask & lmask)
        x = jnp.where(mask, x, 0.0)
    part = jnp.sum(x, axis=2, keepdims=True)   # lane (XLU) reduce -> (nb, cb, 1)
    sum_ref[...] += jnp.sum(part, axis=0)      # cross-vreg adds   -> (cb, 1)


def _apply_kernel(x_ref, shift_ref, o_ref):
    # out = x + (bias - mean); fp32 math, single cast on the store.
    o_ref[...] = (x_ref[...].astype(jnp.float32) + shift_ref[...]).astype(o_ref.dtype)


# ----------------------------------------------------------------------------
# Tiling / budgeting helpers.
# ----------------------------------------------------------------------------
def _floor_to(v, m):
    return (v // m) * m


def _vmem_limit_bytes():
    cap = 64 << 20                      # conservative default: v7x per-TC VMEM
    try:
        info = pltpu.get_tpu_info()
        cap = int(getattr(info, "vmem_capacity_bytes", cap) or cap)
    except Exception:
        pass
    # ~3/4 of physical VMEM: ~48 MiB on v7x (64 MiB), ~96 MiB on v5e/v6e (128 MiB).
    return (cap * 3) // 4


def _tile_elem_budget(itemsize, vmem_limit):
    # Apply-pass working set ~= 2 in + 2 out double-buffered tiles + fp32 temps.
    per_elem = 4 * itemsize + 4
    return max((vmem_limit // 2) // per_elem, 8 * 128)


def _tiles_2d(N, C, itemsize, vmem_limit):
    elems = _tile_elem_budget(itemsize, vmem_limit)
    nb = N if N <= 512 else 512                       # sublane block (8-mult or full)
    if C <= 128:
        cb = C                                        # full lane extent
    else:
        cb = max(128, _floor_to(min(max(elems // nb, 128), 2048, C), 128))
        if pl.cdiv(C, cb) < 2 and C >= 256:
            cb = max(128, _floor_to(C // 2, 128))     # >=2 blocks for v7x megacore
    return nb, cb


def _tiles_3d(N, C, L, itemsize, vmem_limit):
    elems = _tile_elem_budget(itemsize, vmem_limit)
    # L on lanes: multiple of 128 (partial edge block masked) or full extent.
    lb = L if L <= 128 else max(128, _floor_to(min(L, 2048), 128))
    # C on sublanes: multiple of 8 or full extent.
    if C <= 8:
        cb = C
    else:
        cb = min(C, 256)
        if cb < C:
            cb = max(8, _floor_to(cb, 8))
        if pl.cdiv(C, cb) < 2 and C >= 16:
            cb = max(8, _floor_to(C // 2, 8))         # >=2 blocks for v7x megacore
    nb = max(1, min(N, elems // max(cb * lb, 1)))     # leading dim, no layout rule
    return nb, cb, lb


def _compiler_params(dim_semantics, vmem_limit):
    return pltpu.CompilerParams(dimension_semantics=dim_semantics,
                                vmem_limit_bytes=int(vmem_limit))


# ----------------------------------------------------------------------------
# Wrapper.
# ----------------------------------------------------------------------------
def batchnorm1d_centering_forward(x, bias, running_mean, momentum=0.1,
                                  training=True):
    """Forward of BatchNorm1dCentering.

    x            : (N, C) or (N, C, L)
    bias         : (C,)
    running_mean : (C,)
    Returns (output, new_running_mean).  new_running_mean keeps the intended
    per-channel (C,) EMA semantics (the literal PyTorch code broadcasts the
    keepdim mean against the (C,) buffer, producing a (1, C, C) tensor for 3-D
    inputs; that quirk is deliberately not reproduced).
    """
    # TODO(synk): momentum=None (cumulative moving average driven by
    # num_batches_tracked) is stateful module bookkeeping; pass the effective
    # exponential_average_factor as `momentum` instead.
    assert x.ndim in (2, 3)
    vmem_limit = _vmem_limit_bytes()
    itemsize = x.dtype.itemsize
    bias_f32 = bias.astype(jnp.float32)

    if x.ndim == 2:
        N, C = x.shape
        count = N
        nb, cb = _tiles_2d(N, C, itemsize, vmem_limit)
        grid = (pl.cdiv(C, cb), pl.cdiv(N, nb))
        # TODO(synk): sweep pipeline_mode=pl.Buffered(3) on x_spec once tiles
        # are small relative to the VMEM budget.
        x_spec = pl.BlockSpec((nb, cb), lambda c, n: (n, c))
        vec_spec = pl.BlockSpec((1, cb), lambda c, n: (0, c))
        nelems = N * C

        if training:
            sums = pl.pallas_call(
                functools.partial(_sum2d_kernel, n_total=N,
                                  mask_rows=(N % nb != 0)),
                out_shape=jax.ShapeDtypeStruct((1, C), jnp.float32),
                grid_spec=pltpu.PrefetchScalarGridSpec(
                    num_scalar_prefetch=0, grid=grid,
                    in_specs=[x_spec], out_specs=vec_spec),
                compiler_params=_compiler_params(("parallel", "arbitrary"),
                                                 vmem_limit),
                cost_estimate=pl.CostEstimate(
                    flops=nelems, transcendentals=0,
                    bytes_accessed=nelems * itemsize + 4 * C),
            )(x)
            mean = sums[0] / count                               # (C,) fp32
        else:
            mean = running_mean.astype(jnp.float32)

        shift = (bias_f32 - mean).reshape(1, C)
        out = pl.pallas_call(
            _apply_kernel,
            out_shape=jax.ShapeDtypeStruct((N, C), x.dtype),
            grid_spec=pltpu.PrefetchScalarGridSpec(
                num_scalar_prefetch=0, grid=grid,
                in_specs=[x_spec, vec_spec], out_specs=x_spec),
            compiler_params=_compiler_params(("parallel", "parallel"),
                                             vmem_limit),
            cost_estimate=pl.CostEstimate(
                flops=nelems, transcendentals=0,
                bytes_accessed=2 * nelems * itemsize + 4 * C),
        )(x, shift)

    else:
        N, C, L = x.shape
        count = N * L
        nb, cb, lb = _tiles_3d(N, C, L, itemsize, vmem_limit)
        grid = (pl.cdiv(C, cb), pl.cdiv(N, nb), pl.cdiv(L, lb))
        x_spec = pl.BlockSpec((nb, cb, lb), lambda c, n, l: (n, c, l))
        sum_spec = pl.BlockSpec((cb, 1), lambda c, n, l: (c, 0))
        shift_spec = pl.BlockSpec((1, cb, 1), lambda c, n, l: (0, c, 0))
        nelems = N * C * L

        if training:
            sums = pl.pallas_call(
                functools.partial(_sum3d_kernel, n_total=N, l_total=L,
                                  mask_rows=(N % nb != 0),
                                  mask_lanes=(L % lb != 0)),
                out_shape=jax.ShapeDtypeStruct((C, 1), jnp.float32),
                grid_spec=pltpu.PrefetchScalarGridSpec(
                    num_scalar_prefetch=0, grid=grid,
                    in_specs=[x_spec], out_specs=sum_spec),
                compiler_params=_compiler_params(
                    ("parallel", "arbitrary", "arbitrary"), vmem_limit),
                cost_estimate=pl.CostEstimate(
                    flops=nelems, transcendentals=0,
                    bytes_accessed=nelems * itemsize + 4 * C),
            )(x)
            mean = sums[:, 0] / count                            # (C,) fp32
        else:
            mean = running_mean.astype(jnp.float32)

        shift = (bias_f32 - mean).reshape(1, C, 1)
        out = pl.pallas_call(
            _apply_kernel,
            out_shape=jax.ShapeDtypeStruct((N, C, L), x.dtype),
            grid_spec=pltpu.PrefetchScalarGridSpec(
                num_scalar_prefetch=0, grid=grid,
                in_specs=[x_spec, shift_spec], out_specs=x_spec),
            compiler_params=_compiler_params(
                ("parallel", "parallel", "parallel"), vmem_limit),
            cost_estimate=pl.CostEstimate(
                flops=nelems, transcendentals=0,
                bytes_accessed=2 * nelems * itemsize + 4 * C),
        )(x, shift)

    if training:
        new_running_mean = (
            (1.0 - momentum) * running_mean.astype(jnp.float32) + momentum * mean
        ).astype(running_mean.dtype)
    else:
        new_running_mean = running_mean
    return out, new_running_mean


# ----------------------------------------------------------------------------
# Self-test.
# ----------------------------------------------------------------------------
if __name__ == "__main__":
    momentum = 0.1
    N, C, L = 2, 4, 16

    x3 = jax.random.normal(jax.random.PRNGKey(0), (N, C, L), dtype=jnp.float32)
    # Deterministic parameter init matching reset_parameters():
    bias = jnp.zeros((C,), dtype=jnp.float32)           # init.zeros_(bias)
    running_mean = jnp.zeros((C,), dtype=jnp.float32)   # running_mean.zero_()

    # ---- training, 3-D input ----
    out, new_rm = batchnorm1d_centering_forward(
        x3, bias, running_mean, momentum=momentum, training=True)
    out = jax.block_until_ready(out)
    new_rm = jax.block_until_ready(new_rm)
    ref_mean = jnp.mean(x3, axis=(0, 2), keepdims=True)
    ref_out = x3 - ref_mean + bias.reshape(1, C, 1)
    ref_rm = (1.0 - momentum) * running_mean + momentum * ref_mean[0, :, 0]
    assert out.shape == x3.shape
    assert jnp.allclose(out, ref_out, atol=1e-5, rtol=1e-5)
    assert new_rm.shape == (C,)
    assert jnp.allclose(new_rm, ref_rm, atol=1e-6, rtol=1e-6)

    # ---- training, 2-D input ----
    x2d = jax.random.normal(jax.random.PRNGKey(1), (8, C), dtype=jnp.float32)
    out2d, _ = batchnorm1d_centering_forward(
        x2d, bias, running_mean, momentum=momentum, training=True)
    out2d = jax.block_until_ready(out2d)
    ref2d = x2d - jnp.mean(x2d, axis=0, keepdims=True) + bias.reshape(1, C)
    assert jnp.allclose(out2d, ref2d, atol=1e-5, rtol=1e-5)

    # ---- training, 3-D with partial edge blocks (C=20, L=200) ----
    xb = jax.random.normal(jax.random.PRNGKey(2), (3, 20, 200), dtype=jnp.float32)
    bb = jnp.linspace(-1.0, 1.0, 20, dtype=jnp.float32)
    rb = jnp.zeros((20,), dtype=jnp.float32)
    outb, rmb = batchnorm1d_centering_forward(
        xb, bb, rb, momentum=momentum, training=True)
    outb = jax.block_until_ready(outb)
    refb_mean = jnp.mean(xb, axis=(0, 2), keepdims=True)
    refb = xb - refb_mean + bb.reshape(1, 20, 1)
    assert jnp.allclose(outb, refb, atol=1e-5, rtol=1e-5)
    assert jnp.allclose(rmb, momentum * refb_mean[0, :, 0], atol=1e-6, rtol=1e-6)

    # ---- training, 2-D with row tiling + row masking (N > row block) ----
    xr = jax.random.normal(jax.random.PRNGKey(3), (600, 20), dtype=jnp.float32)
    outr, _ = batchnorm1d_centering_forward(
        xr, bb, rb, momentum=momentum, training=True)
    outr = jax.block_until_ready(outr)
    refr = xr - jnp.mean(xr, axis=0, keepdims=True) + bb.reshape(1, 20)
    assert jnp.allclose(outr, refr, atol=1e-5, rtol=1e-5)

    # ---- eval (running-mean) path, 3-D ----
    out_ev, rm_ev = batchnorm1d_centering_forward(
        x3, bias, new_rm, momentum=momentum, training=False)
    out_ev = jax.block_until_ready(out_ev)
    ref_ev = x3 - new_rm.reshape(1, C, 1) + bias.reshape(1, C, 1)
    assert jnp.allclose(out_ev, ref_ev, atol=1e-5, rtol=1e-5)
    assert jnp.allclose(rm_ev, new_rm)

    print("KERNEL_OK")
</pallas_src>

<mosaic_0001>
module attributes {stable_mosaic.version = 11 : i64} {
  func.func @_sum3d_kernel(%arg0: i32, %arg1: i32, %arg2: i32, %arg3: memref<2x4x16xf32, #tpu.memory_space<vmem>>, %arg4: memref<4x1xf32, #tpu.memory_space<vmem>>) attributes {dimension_semantics = [#tpu.dimension_semantics<parallel>, #tpu.dimension_semantics<arbitrary>, #tpu.dimension_semantics<arbitrary>], iteration_bounds = array<i64: 1, 1, 1>, scalar_prefetch = 0 : i64, scratch_operands = 0 : i64, tpu.core_type = #tpu.core_type<tc>, window_params = [{transform_indices = @transform_0, window_bounds = array<i64: 2, 4, 16>}, {transform_indices = @transform_1, window_bounds = array<i64: 4, 1>}]} {
    %c0_i32 = arith.constant 0 : i32
    %0 = arith.cmpi eq, %arg1, %c0_i32 : i32
    %c0_i32_0 = arith.constant 0 : i32
    %1 = arith.cmpi eq, %arg2, %c0_i32_0 : i32
    %2 = arith.andi %0, %1 : i1
    %3 = arith.extui %2 : i1 to i32
    %c0_i32_1 = arith.constant 0 : i32
    %4 = arith.cmpi ne, %3, %c0_i32_1 : i32
    scf.if %4 {
      %cst_9 = arith.constant 0.000000e+00 : f32
      %12 = vector.broadcast %cst_9 : f32 to vector<4x1xf32>
      %c0_10 = arith.constant 0 : index
      %c0_11 = arith.constant 0 : index
      %13 = vector.load %arg4[%c0_10, %c0_11] : memref<4x1xf32, #tpu.memory_space<vmem>>, vector<4x1xf32>
      tpu.vector_store %arg4[%c0_10, %c0_11], %12 {strides = array<i32>} : memref<4x1xf32, #tpu.memory_space<vmem>>, vector<4x1xf32>,
    } else {
    }
    %c0 = arith.constant 0 : index
    %c0_2 = arith.constant 0 : index
    %c0_3 = arith.constant 0 : index
    %5 = vector.load %arg3[%c0, %c0_2, %c0_3] : memref<2x4x16xf32, #tpu.memory_space<vmem>>, vector<2x4x16xf32>
    %cst = arith.constant dense<0.000000e+00> : vector<2x4xf32>
    %6 = vector.multi_reduction <add>, %5, %cst [2] : vector<2x4x16xf32> to vector<2x4xf32>
    %7 = vector.shape_cast %6 : vector<2x4xf32> to vector<2x4x1xf32>
    %c0_4 = arith.constant 0 : index
    %c0_5 = arith.constant 0 : index
    %8 = vector.load %arg4[%c0_4, %c0_5] : memref<4x1xf32, #tpu.memory_space<vmem>>, vector<4x1xf32>
    %cst_6 = arith.constant dense<0.000000e+00> : vector<4x1xf32>
    %9 = vector.multi_reduction <add>, %7, %cst_6 [0] : vector<2x4x1xf32> to vector<4x1xf32>
    %10 = arith.addf %8, %9 : vector<4x1xf32>
    %c0_7 = arith.constant 0 : index
    %c0_8 = arith.constant 0 : index
    %11 = vector.load %arg4[%c0_7, %c0_8] : memref<4x1xf32, #tpu.memory_space<vmem>>, vector<4x1xf32>
    tpu.vector_store %arg4[%c0_7, %c0_8], %10 {strides = array<i32>} : memref<4x1xf32, #tpu.memory_space<vmem>>, vector<4x1xf32>,
    return
  }
  func.func @transform_0(%arg0: i32, %arg1: i32, %arg2: i32) -> (i32, i32, i32) {
    %c0_i32 = arith.constant 0 : i32
    return %arg1, %arg0, %arg2 : i32, i32, i32
  }
  func.func @transform_1(%arg0: i32, %arg1: i32, %arg2: i32) -> (i32, i32) {
    %c0_i32 = arith.constant 0 : i32
    %c0_i32_0 = arith.constant 0 : i32
    return %arg0, %c0_i32 : i32, i32
  }
}

</mosaic_0001>

<bundles_post_ra>
// kernel: tpu_custom_call.1
= control target key start
LH: loop header
LB: loop body
LE: loop exit
PB: predicated region body
PF: predicated region fallthrough
CT: control target
= control target key end

     0   :  { %6 = vsyncpa [#allocation3], 0  ;;  %s78_s6 = smov [#allocation2]   ;;  %s106_s0 = inlined_call_operand.hbm [shape: f32[2,4,16], index: 0, kind: input, shape index: {}]   ;;  %s107_s1 = inlined_call_operand.vmem [shape: f32[4,1], index: 1, kind: output, shape index: {}]  }
   0x1   :  { %s12_s7 = sshll.u32 %s78_s6, 4  ;;  %s13_s7 = int_to_ptr.vmem [resolvable:$true] %s12_s7 }
   0x2   :  { %s64_s8 = scalar_lea.vmem %s13_s7, 128  ;;  %p69_p1 = scmp.lt.s32.totalorder %s13_s7, %s13_s7 }
   0x3   :  { %p65_p0 = scmp.ne.s32.totalorder %s13_s7, %s64_s8  ;;  %p70_p2 = scmp.lt.s32.totalorder %s64_s8, %s64_s8 }
   0x5   :  { %p71_p3 = por %p70_p2, %p69_p1 }
   0x7   :  { %p72_p4 = pnand %p71_p3, %p65_p0 }
   0x9   :  { %75 = shalt.err (!%p72_p4)
}
   0xa   :  { %s79_s9 = smov 64   ;;  %s80_s10 = smov 4  }
   0xb   :  { %18 = dma.hbm_to_vmem [thread:$0]  %s106_s0, 128, %s13_s7, [#allocation3], %s79_s9, %s79_s9, %s80_s10  }
   0xc   :  { %76 = dma.done.wait [#allocation3], 128  }
   0xd   :  { %77 = vsyncadd [#allocation3], 4294967168  ;;  %vm28_vm0 = vcmask 3072   ;;  %v81_v0 = vmov 0.0   ;;  %vm32_vm1 = vcmask 125952   ;;  %vm40_vm2 = vcmask 1043456  }
   0xe   :  { %29 = vst.msk [vmem:[%s107_s1] sm:$0xf] %vm28_vm0, %v81_v0  ;;  %v30_v1 = vld [vmem:[#allocation2] sm:$0xf]  ;;  %v31_v2 = vld [vmem:[#allocation2 + $0x4] sm:$0xf] }
   0xf   :  { %v33_v3 = vsel %vm32_vm1, %v30_v1, 0.0  ;;  %v36_v4 = vsel %vm32_vm1, %v31_v2, 0.0 }
  0x10   :  { %34 = vadd.xlane.f32.xlu0 %v33_v3 }
  0x14   :  { %37 = vadd.xlane.f32.xlu0 %v36_v4 }
  0x15   :  { %v39_v8 = vld [vmem:[%s107_s1] sm:$0xf] }
  0x99   :  { %v35_v5 = vpop.xlane.xlu0 %34 }
  0x9a   :  { %v41_v7 = vsel %vm40_vm2, %v35_v5, 0.0 }
  0x9d   :  { %v38_v6 = vpop.xlane.xlu0 %37 }
  0x9e   :  { %v42_v9 = vsel %vm40_vm2, %v38_v6, 0.0 }
  0x9f   :  { %v43_v10 = vadd.f32 %v42_v9, %v41_v7 }
  0xa1   :  { %v44_v11 = vadd.f32 %v43_v10, %v39_v8 }
  0xa3   :  { %46 = vst.msk [vmem:[%s107_s1] sm:$0xf] %vm28_vm0, %v44_v11 }
  0xa4   :  { %51 = vsyncpa [#allocation3], 1 }

</bundles_post_ra>
